<compile_context>
chip_gen: v6e
topology: v6e:2x2x1
jax: 0.10.0
libtpu: 0.0.40
codegen_flags: <defaults>
</compile_context>

<pallas_src>
import functools

import jax
import jax.numpy as jnp
from jax import lax
from jax.experimental import pallas as pl
from jax.experimental.pallas import tpu as pltpu


def _round_up(x, m):
    return ((x + m - 1) // m) * m


def _hard_negative_kernel(lab_ref, rmax_ref, f_ref, loss_ref, idx_ref, acc_ref,
                          *, normalize):
    """Grid axis 0 runs over D-chunks ('arbitrary'); acc_ref is the (N, N)
    running Chebyshev max, resident in VMEM scratch across the whole grid."""
    N = f_ref.shape[0]
    k = pl.program_id(0)
    nk = pl.num_programs(0)

    @pl.when(k == 0)
    def _init():
        acc_ref[...] = jnp.zeros_like(acc_ref)   # distances are >= 0

    # Per-chunk features, widened to f32 for the VPU (v5e-safe; bf16 stays
    # narrow on the wire).
    f = f_ref[...].astype(jnp.float32)           # (N, tile_d)
    if normalize:
        # EUP reciprocal (separate VLIW slot) + one multiply per element,
        # instead of a per-element divide on the VALU.
        f = f * pl.reciprocal(rmax_ref[...], approx=True)   # (N,1) lane-bcast

    # Pairwise per-chunk Chebyshev max without materializing (N, N, tile_d):
    # one sublane-broadcast subtract + lane-reduce per row (N is small and
    # static, so this unrolls).
    # TODO(synk): for large N, block this loop / add a "parallel" i-block grid
    #             axis so v7x's two TensorCores shard the columns.
    cols = []
    for i in range(N):
        d_i = jnp.max(jnp.abs(f - f[i:i + 1, :]), axis=1, keepdims=True)  # (N,1)
        cols.append(d_i)
    cur = jnp.concatenate(cols, axis=1)          # (N, N): cur[j,i] over this chunk
    acc_ref[...] = jnp.maximum(acc_ref[...], cur)

    @pl.when(k == nk - 1)
    def _finalize():
        dist = acc_ref[...]                      # (N, N) full Chebyshev distances
        lab_row = lab_ref[...]                   # (1, N) int32, labels[i]

        row_iota = lax.broadcasted_iota(jnp.int32, (N, N), 0)   # j
        col_iota = lax.broadcasted_iota(jnp.int32, (N, N), 1)   # i
        # Rebuild the column orientation labels[j] from the single (1, N) row
        # (diagonal pick + lane reduction -> no transpose / no extra DMA).
        lab_col = jnp.sum(jnp.where(row_iota == col_iota, lab_row, 0),
                          axis=1, keepdims=True)                # (N, 1)
        same = lab_col == lab_row                               # (N, N)

        masked = jnp.where(same, jnp.inf, dist)
        min_col = jnp.min(masked, axis=0, keepdims=True)        # (1, N)
        closest = jnp.min(jnp.where(masked == min_col, row_iota, N),
                          axis=0, keepdims=True)                # first argmin, (1, N)

        # torch gathers the UNMASKED distance dist[i, closest[i]]:
        #  * normal case: equals the masked minimum (symmetric matrix);
        #  * all-same-label column: masked min is +inf, torch's argmin of an
        #    all-inf vector is 0 -> use dist[0, i].
        loss_vals = jnp.where(jnp.isinf(min_col), dist[0:1, :], min_col)  # (1, N)

        loss_ref[...] = jnp.sum(loss_vals, axis=1, keepdims=True) * (1.0 / N)
        idx_ref[...] = closest.astype(jnp.int32)


def hard_negative_loss(feats, labels, image_idxs, normalize_feats, *,
                       tile_d=None):
    """Returns (loss_scalar, closest_pairs) like HardNegativeLoss.forward."""
    N = feats.shape[0]
    f2d = feats.reshape(N, -1)                   # keep input dtype on the wire
    D = f2d.shape[1]

    # Per-row plain max (torch: feats.max(dim=1)[0]) — needs the full row
    # before the first distance chunk, so it is one cheap wrapper reduction.
    if normalize_feats:
        rmax = jnp.max(f2d, axis=1, keepdims=True).astype(jnp.float32)  # (N, 1)
    else:
        rmax = jnp.ones((N, 1), jnp.float32)

    # D-chunk size: lane-aligned (multiple of 128); default sized so the
    # double-buffered feature chunks stay well under the scoped VMEM budget
    # (v7x has only 64 MiB physical VMEM).
    if tile_d is None:
        itemsize = jnp.dtype(f2d.dtype).itemsize
        cap = max(128, (8 * 1024 * 1024 // max(1, N * itemsize)) // 128 * 128)
        tile_d = min(_round_up(D, 128), cap)
    else:
        tile_d = max(128, (int(tile_d) // 128) * 128)

    D_pad = _round_up(D, tile_d)
    if D_pad != D:
        # Zero padding is distance-neutral: |0 - 0| never raises the max.
        f2d = jnp.pad(f2d, ((0, 0), (0, D_pad - D)))
    nk = D_pad // tile_d

    lab_row = labels.astype(jnp.int32).reshape(1, N)

    kernel = functools.partial(_hard_negative_kernel,
                               normalize=bool(normalize_feats))

    loss2d, idx2d = pl.pallas_call(
        kernel,
        out_shape=(jax.ShapeDtypeStruct((1, 1), jnp.float32),
                   jax.ShapeDtypeStruct((1, N), jnp.int32)),
        grid=(nk,),
        in_specs=[
            pl.BlockSpec((1, N), lambda k: (0, 0)),        # labels (lane-dense row)
            pl.BlockSpec((N, 1), lambda k: (0, 0)),        # per-row max (f32)
            pl.BlockSpec((N, tile_d), lambda k: (0, k)),   # feature chunk
        ],
        out_specs=(
            pl.BlockSpec((1, 1), lambda k: (0, 0)),
            pl.BlockSpec((1, N), lambda k: (0, 0)),
        ),
        scratch_shapes=[pltpu.VMEM((N, N), jnp.float32)],
        compiler_params=pltpu.CompilerParams(
            dimension_semantics=("arbitrary",),            # D is a reduction axis
            vmem_limit_bytes=48 * 1024 * 1024),
    )(lab_row, rmax, f2d)

    loss = loss2d[0, 0]
    closest_idx = idx2d[0]
    closest_pairs = jnp.take(image_idxs, closest_idx, axis=0)
    return loss, closest_pairs


if __name__ == "__main__":
    key = jax.random.PRNGKey(0)

    # Small shapes consistent with the module: batch of 8 feature maps (NCHW).
    N, C, H, W = 8, 4, 8, 8                      # D = 256 -> two 128-wide chunks
    feats = jax.random.normal(key, (N, C, H, W), dtype=jnp.float32)
    labels = jnp.array([0, 1, 0, 2, 1, 2, 0, 1], dtype=jnp.int32)
    image_idxs = jnp.arange(100, 100 + N, dtype=jnp.int32)

    # tile_d=128 exercises the multi-chunk grid / accumulator path (D=256).
    loss, closest_pairs = hard_negative_loss(feats, labels, image_idxs,
                                             normalize_feats=True, tile_d=128)
    jax.block_until_ready((loss, closest_pairs))
    print("KERNEL_OK")
</pallas_src>

<mosaic_0001>
module attributes {stable_mosaic.version = 11 : i64} {
  func.func @_hard_negative_kernel(%arg0: i32, %arg1: memref<1x8xi32, #tpu.memory_space<vmem>>, %arg2: memref<8x1xf32, #tpu.memory_space<vmem>>, %arg3: memref<8x128xf32, #tpu.memory_space<vmem>>, %arg4: memref<1x1xf32, #tpu.memory_space<vmem>>, %arg5: memref<1x8xi32, #tpu.memory_space<vmem>>, %arg6: memref<8x8xf32, #tpu.memory_space<vmem>>) attributes {dimension_semantics = [#tpu.dimension_semantics<arbitrary>], iteration_bounds = array<i64: 2>, scalar_prefetch = 0 : i64, scratch_operands = 1 : i64, tpu.core_type = #tpu.core_type<tc>, window_params = [{pipeline_mode = #tpu.pipeline_mode<synchronous>, transform_indices = @transform_0, window_bounds = array<i64: 1, 8>}, {pipeline_mode = #tpu.pipeline_mode<synchronous>, transform_indices = @transform_1, window_bounds = array<i64: 8, 1>}, {transform_indices = @transform_2, window_bounds = array<i64: 8, 128>}, {pipeline_mode = #tpu.pipeline_mode<synchronous>, transform_indices = @transform_3, window_bounds = array<i64: 1, 1>}, {pipeline_mode = #tpu.pipeline_mode<synchronous>, transform_indices = @transform_4, window_bounds = array<i64: 1, 8>}]} {
    %c0_i32 = arith.constant 0 : i32
    %0 = arith.cmpi eq, %arg0, %c0_i32 : i32
    %1 = arith.extui %0 : i1 to i32
    %c0_i32_0 = arith.constant 0 : i32
    %2 = arith.cmpi ne, %1, %c0_i32_0 : i32
    scf.if %2 {
      %cst_16 = arith.constant 0.000000e+00 : f32
      %63 = vector.broadcast %cst_16 : f32 to vector<8x8xf32>
      %c0_17 = arith.constant 0 : index
      %c0_18 = arith.constant 0 : index
      %64 = vector.load %arg6[%c0_17, %c0_18] : memref<8x8xf32, #tpu.memory_space<vmem>>, vector<8x8xf32>
      tpu.vector_store %arg6[%c0_17, %c0_18], %63 {strides = array<i32>} : memref<8x8xf32, #tpu.memory_space<vmem>>, vector<8x8xf32>,
    } else {
    }
    %c0 = arith.constant 0 : index
    %c0_1 = arith.constant 0 : index
    %3 = vector.load %arg3[%c0, %c0_1] : memref<8x128xf32, #tpu.memory_space<vmem>>, vector<8x128xf32>
    %c0_2 = arith.constant 0 : index
    %c0_3 = arith.constant 0 : index
    %4 = vector.load %arg2[%c0_2, %c0_3] : memref<8x1xf32, #tpu.memory_space<vmem>>, vector<8x1xf32>
    %5 = tpu.reciprocal %4 {approx = true} : vector<8x1xf32> -> vector<8x1xf32>
    %6 = vector.broadcast %5 : vector<8x1xf32> to vector<8x128xf32>
    %7 = arith.mulf %3, %6 : vector<8x128xf32>
    %8 = vector.extract_strided_slice %7 {offsets = [0, 0], sizes = [1, 128], strides = [1, 1]} : vector<8x128xf32> to vector<1x128xf32>
    %9 = vector.broadcast %8 : vector<1x128xf32> to vector<8x128xf32>
    %10 = arith.subf %7, %9 : vector<8x128xf32>
    %11 = math.absf %10 : vector<8x128xf32>
    %cst = arith.constant dense<0xFF800000> : vector<8xf32>
    %12 = vector.multi_reduction <maximumf>, %11, %cst [1] : vector<8x128xf32> to vector<8xf32>
    %13 = vector.shape_cast %12 : vector<8xf32> to vector<8x1xf32>
    %14 = vector.extract_strided_slice %7 {offsets = [1, 0], sizes = [1, 128], strides = [1, 1]} : vector<8x128xf32> to vector<1x128xf32>
    %15 = vector.broadcast %14 : vector<1x128xf32> to vector<8x128xf32>
    %16 = arith.subf %7, %15 : vector<8x128xf32>
    %17 = math.absf %16 : vector<8x128xf32>
    %cst_4 = arith.constant dense<0xFF800000> : vector<8xf32>
    %18 = vector.multi_reduction <maximumf>, %17, %cst_4 [1] : vector<8x128xf32> to vector<8xf32>
    %19 = vector.shape_cast %18 : vector<8xf32> to vector<8x1xf32>
    %20 = vector.extract_strided_slice %7 {offsets = [2, 0], sizes = [1, 128], strides = [1, 1]} : vector<8x128xf32> to vector<1x128xf32>
    %21 = vector.broadcast %20 : vector<1x128xf32> to vector<8x128xf32>
    %22 = arith.subf %7, %21 : vector<8x128xf32>
    %23 = math.absf %22 : vector<8x128xf32>
    %cst_5 = arith.constant dense<0xFF800000> : vector<8xf32>
    %24 = vector.multi_reduction <maximumf>, %23, %cst_5 [1] : vector<8x128xf32> to vector<8xf32>
    %25 = vector.shape_cast %24 : vector<8xf32> to vector<8x1xf32>
    %26 = vector.extract_strided_slice %7 {offsets = [3, 0], sizes = [1, 128], strides = [1, 1]} : vector<8x128xf32> to vector<1x128xf32>
    %27 = vector.broadcast %26 : vector<1x128xf32> to vector<8x128xf32>
    %28 = arith.subf %7, %27 : vector<8x128xf32>
    %29 = math.absf %28 : vector<8x128xf32>
    %cst_6 = arith.constant dense<0xFF800000> : vector<8xf32>
    %30 = vector.multi_reduction <maximumf>, %29, %cst_6 [1] : vector<8x128xf32> to vector<8xf32>
    %31 = vector.shape_cast %30 : vector<8xf32> to vector<8x1xf32>
    %32 = vector.extract_strided_slice %7 {offsets = [4, 0], sizes = [1, 128], strides = [1, 1]} : vector<8x128xf32> to vector<1x128xf32>
    %33 = vector.broadcast %32 : vector<1x128xf32> to vector<8x128xf32>
    %34 = arith.subf %7, %33 : vector<8x128xf32>
    %35 = math.absf %34 : vector<8x128xf32>
    %cst_7 = arith.constant dense<0xFF800000> : vector<8xf32>
    %36 = vector.multi_reduction <maximumf>, %35, %cst_7 [1] : vector<8x128xf32> to vector<8xf32>
    %37 = vector.shape_cast %36 : vector<8xf32> to vector<8x1xf32>
    %38 = vector.extract_strided_slice %7 {offsets = [5, 0], sizes = [1, 128], strides = [1, 1]} : vector<8x128xf32> to vector<1x128xf32>
    %39 = vector.broadcast %38 : vector<1x128xf32> to vector<8x128xf32>
    %40 = arith.subf %7, %39 : vector<8x128xf32>
    %41 = math.absf %40 : vector<8x128xf32>
    %cst_8 = arith.constant dense<0xFF800000> : vector<8xf32>
    %42 = vector.multi_reduction <maximumf>, %41, %cst_8 [1] : vector<8x128xf32> to vector<8xf32>
    %43 = vector.shape_cast %42 : vector<8xf32> to vector<8x1xf32>
    %44 = vector.extract_strided_slice %7 {offsets = [6, 0], sizes = [1, 128], strides = [1, 1]} : vector<8x128xf32> to vector<1x128xf32>
    %45 = vector.broadcast %44 : vector<1x128xf32> to vector<8x128xf32>
    %46 = arith.subf %7, %45 : vector<8x128xf32>
    %47 = math.absf %46 : vector<8x128xf32>
    %cst_9 = arith.constant dense<0xFF800000> : vector<8xf32>
    %48 = vector.multi_reduction <maximumf>, %47, %cst_9 [1] : vector<8x128xf32> to vector<8xf32>
    %49 = vector.shape_cast %48 : vector<8xf32> to vector<8x1xf32>
    %50 = vector.extract_strided_slice %7 {offsets = [7, 0], sizes = [1, 128], strides = [1, 1]} : vector<8x128xf32> to vector<1x128xf32>
    %51 = vector.broadcast %50 : vector<1x128xf32> to vector<8x128xf32>
    %52 = arith.subf %7, %51 : vector<8x128xf32>
    %53 = math.absf %52 : vector<8x128xf32>
    %cst_10 = arith.constant dense<0xFF800000> : vector<8xf32>
    %54 = vector.multi_reduction <maximumf>, %53, %cst_10 [1] : vector<8x128xf32> to vector<8xf32>
    %55 = vector.shape_cast %54 : vector<8xf32> to vector<8x1xf32>
    %56 = tpu.concatenate %13, %19, %25, %31, %37, %43, %49, %55 in 1 : vector<8x1xf32>, vector<8x1xf32>, vector<8x1xf32>, vector<8x1xf32>, vector<8x1xf32>, vector<8x1xf32>, vector<8x1xf32>, vector<8x1xf32> -> vector<8x8xf32>
    %c0_11 = arith.constant 0 : index
    %c0_12 = arith.constant 0 : index
    %57 = vector.load %arg6[%c0_11, %c0_12] : memref<8x8xf32, #tpu.memory_space<vmem>>, vector<8x8xf32>
    %58 = arith.maximumf %57, %56 : vector<8x8xf32>
    %c0_13 = arith.constant 0 : index
    %c0_14 = arith.constant 0 : index
    %59 = vector.load %arg6[%c0_13, %c0_14] : memref<8x8xf32, #tpu.memory_space<vmem>>, vector<8x8xf32>
    tpu.vector_store %arg6[%c0_13, %c0_14], %58 {strides = array<i32>} : memref<8x8xf32, #tpu.memory_space<vmem>>, vector<8x8xf32>,
    %c1_i32 = arith.constant 1 : i32
    %60 = arith.cmpi eq, %arg0, %c1_i32 : i32
    %61 = arith.extui %60 : i1 to i32
    %c0_i32_15 = arith.constant 0 : i32
    %62 = arith.cmpi ne, %61, %c0_i32_15 : i32
    scf.if %62 {
      %c0_16 = arith.constant 0 : index
      %c0_17 = arith.constant 0 : index
      %63 = vector.load %arg6[%c0_16, %c0_17] : memref<8x8xf32, #tpu.memory_space<vmem>>, vector<8x8xf32>
      %c0_18 = arith.constant 0 : index
      %c0_19 = arith.constant 0 : index
      %64 = vector.load %arg1[%c0_18, %c0_19] : memref<1x8xi32, #tpu.memory_space<vmem>>, vector<1x8xi32>
      %65 = tpu.iota {dimensions = array<i32: 0>} : vector<8x8xi32>
      %66 = tpu.iota {dimensions = array<i32: 1>} : vector<8x8xi32>
      %67 = arith.cmpi eq, %65, %66 : vector<8x8xi32>
      %c0_i32_20 = arith.constant 0 : i32
      %68 = vector.shape_cast %64 : vector<1x8xi32> to vector<1x8xi32>
      %69 = vector.broadcast %68 : vector<1x8xi32> to vector<8x8xi32>
      %70 = vector.broadcast %c0_i32_20 : i32 to vector<8x8xi32>
      %71 = arith.select %67, %69, %70 : vector<8x8xi1>, vector<8x8xi32>
      %cst_21 = arith.constant dense<0> : vector<8xi32>
      %72 = vector.multi_reduction <add>, %71, %cst_21 [1] : vector<8x8xi32> to vector<8xi32>
      %73 = vector.shape_cast %72 : vector<8xi32> to vector<8x1xi32>
      %74 = vector.broadcast %73 : vector<8x1xi32> to vector<8x8xi32>
      %75 = vector.broadcast %64 : vector<1x8xi32> to vector<8x8xi32>
      %76 = arith.cmpi eq, %74, %75 : vector<8x8xi32>
      %cst_22 = arith.constant 0x7F800000 : f32
      %77 = vector.broadcast %cst_22 : f32 to vector<8x8xf32>
      %78 = arith.select %76, %77, %63 : vector<8x8xi1>, vector<8x8xf32>
      %cst_23 = arith.constant dense<0x7F800000> : vector<8xf32>
      %79 = vector.multi_reduction <minimumf>, %78, %cst_23 [0] : vector<8x8xf32> to vector<8xf32>
      %80 = vector.shape_cast %79 : vector<8xf32> to vector<1x8xf32>
      %81 = vector.broadcast %80 : vector<1x8xf32> to vector<8x8xf32>
      %82 = arith.cmpf oeq, %78, %81 : vector<8x8xf32>
      %c8_i32 = arith.constant 8 : i32
      %83 = vector.broadcast %c8_i32 : i32 to vector<8x8xi32>
      %84 = arith.select %82, %65, %83 : vector<8x8xi1>, vector<8x8xi32>
      %cst_24 = arith.constant dense<2147483647> : vector<8xi32>
      %85 = vector.multi_reduction <minsi>, %84, %cst_24 [0] : vector<8x8xi32> to vector<8xi32>
      %86 = vector.shape_cast %85 : vector<8xi32> to vector<1x8xi32>
      %87 = math.absf %80 : vector<1x8xf32>
      %cst_25 = arith.constant 0x7F800000 : f32
      %88 = vector.broadcast %cst_25 : f32 to vector<1x8xf32>
      %89 = arith.cmpf oeq, %87, %88 : vector<1x8xf32>
      %90 = vector.extract_strided_slice %63 {offsets = [0, 0], sizes = [1, 8], strides = [1, 1]} : vector<8x8xf32> to vector<1x8xf32>
      %91 = arith.select %89, %90, %80 : vector<1x8xi1>, vector<1x8xf32>
      %cst_26 = arith.constant dense<0.000000e+00> : vector<1xf32>
      %92 = vector.multi_reduction <add>, %91, %cst_26 [1] : vector<1x8xf32> to vector<1xf32>
      %93 = vector.shape_cast %92 : vector<1xf32> to vector<1x1xf32>
      %cst_27 = arith.constant 1.250000e-01 : f32
      %94 = vector.broadcast %cst_27 : f32 to vector<1x1xf32>
      %95 = arith.mulf %93, %94 : vector<1x1xf32>
      %c0_28 = arith.constant 0 : index
      %c0_29 = arith.constant 0 : index
      %96 = vector.load %arg4[%c0_28, %c0_29] : memref<1x1xf32, #tpu.memory_space<vmem>>, vector<1x1xf32>
      tpu.vector_store %arg4[%c0_28, %c0_29], %95 {strides = array<i32>} : memref<1x1xf32, #tpu.memory_space<vmem>>, vector<1x1xf32>,
      %c0_30 = arith.constant 0 : index
      %c0_31 = arith.constant 0 : index
      %97 = vector.load %arg5[%c0_30, %c0_31] : memref<1x8xi32, #tpu.memory_space<vmem>>, vector<1x8xi32>
      tpu.vector_store %arg5[%c0_30, %c0_31], %86 {strides = array<i32>} : memref<1x8xi32, #tpu.memory_space<vmem>>, vector<1x8xi32>,
    } else {
    }
    return
  }
  func.func @transform_0(%arg0: i32) -> (i32, i32) {
    %c0_i32 = arith.constant 0 : i32
    %c0_i32_0 = arith.constant 0 : i32
    %c0_i32_1 = arith.constant 0 : i32
    return %c0_i32, %c0_i32_0 : i32, i32
  }
  func.func @transform_1(%arg0: i32) -> (i32, i32) {
    %c0_i32 = arith.constant 0 : i32
    %c0_i32_0 = arith.constant 0 : i32
    %c0_i32_1 = arith.constant 0 : i32
    return %c0_i32, %c0_i32_0 : i32, i32
  }
  func.func @transform_2(%arg0: i32) -> (i32, i32) {
    %c0_i32 = arith.constant 0 : i32
    %c0_i32_0 = arith.constant 0 : i32
    return %c0_i32, %arg0 : i32, i32
  }
  func.func @transform_3(%arg0: i32) -> (i32, i32) {
    %c0_i32 = arith.constant 0 : i32
    %c0_i32_0 = arith.constant 0 : i32
    %c0_i32_1 = arith.constant 0 : i32
    return %c0_i32, %c0_i32_0 : i32, i32
  }
  func.func @transform_4(%arg0: i32) -> (i32, i32) {
    %c0_i32 = arith.constant 0 : i32
    %c0_i32_0 = arith.constant 0 : i32
    %c0_i32_1 = arith.constant 0 : i32
    return %c0_i32, %c0_i32_0 : i32, i32
  }
}

</mosaic_0001>

<bundles_post_ra>
// kernel: tpu_custom_call.1
= control target key start
LH: loop header
LB: loop body
LE: loop exit
PB: predicated region body
PF: predicated region fallthrough
CT: control target
= control target key end

     0   :  { %10 = vsyncpa [#allocation4], 0  ;;  %s807_s0 = inlined_call_operand.vmem [shape: s32[1,8], index: 0, kind: input, shape index: {}]   ;;  %s808_s1 = inlined_call_operand.vmem [shape: f32[8,1], index: 1, kind: input, shape index: {}]   ;;  %s809_s2 = inlined_call_operand.hbm [shape: f32[8,256], index: 2, kind: input, shape index: {}]   ;;  %s810_s3 = inlined_call_operand.hbm [shape: f32[1,1], index: 3, kind: output, shape index: {0}]   ;;  %s811_s4 = inlined_call_operand.hbm [shape: s32[1,8], index: 4, kind: output, shape index: {1}]  }
   0x1   :  { %12 = vsyncpa [#allocation4 + $0x1], 0 }
   0x2   :  { %13 = vsyncpa [#allocation5], 0 }
   0x3   :  { %14 = vsyncpa [#allocation8], 0  ;;  %s661_s15 = smov 0   ;;  %s663_s16 = smov 0  }
   0x4   :  { %s665_s17 = smov 0   ;;  %s667_s18 = smov 0  }
   0x5 LB: > { %s680_s19 = sadd.s32 4294967295, %s629_s18   ;;  %s683_s20 = sadd.s32 1, %s629_s18   ;;  %s629_s18 = sphi %s667_s18, %s821_s18   ;;  %s625_s17 = sphi %s665_s17, %s820_s17   ;;  %s621_s16 = sphi %s663_s16, %s819_s16   ;;  %s617_s15 = sphi %s661_s15, %s818_s15  }
   0x6   : > { %s66_s21 = ssub.s32 %s629_s18, %s683_s20  ;;  %s69_s22 = sadd.s32 1, %s625_s17 }
   0x7   : > { %p67_p0 = scmp.eq.s32.totalorder %s66_s21, 0  ;;  %p76_p1 = scmp.ne.s32.totalorder %s625_s17, %s621_s16 }
   0x8   : > { %p77_p2 = scmp.eq.s32.totalorder %s629_s18, 0  ;;  %p82_p3 = scmp.ne.s32.totalorder %s621_s16, %s617_s15 }
   0x9   : > { %s693_s23 = scalar_select %p67_p0, %s625_s17, %s69_s22  }
   0xa   : > { %p78_p4 = por %p77_p2, %p76_p1  ;;  %p83_p5 = scmp.eq.s32.totalorder %s680_s19, 0 }
   0xb   : > { %p467_p6 = scmp.lt.s32.totalorder %s629_s18, 2  ;;  %s154_s25 = sand.u32 1, %s625_s17  }
   0xc   : > { %p697_p7 = por %p83_p5, %p82_p3  ;;  %s440_s26 = sshll.u32 %s154_s25, 3 }
   0xd   : > { %s441_s27 = sshll.u32 %s629_s18, 7  ;;  %s158_s5 = scalar_lea.vmem [#allocation3], %s440_s26 }
   0xe   : > { %s813_s24 = scalar_select %p697_p7, 1, 0 }
   0xf   : > { %s706_s30 = scalar_lea.hbm %s809_s2, %s441_s27  ;;  %s165_s6 = sshll.u32 %s158_s5, 4  ;;  %s708_s6 = int_to_ptr.vmem [resolvable:$true] %s165_s6 }
  0x10   : > { %p710_p8 = pnand %p467_p6, %p78_p4  ;;  %s155_s8 = scalar_lea.sflag [#allocation4], %s154_s25 }
  0x11   : > { %s511_s9 = scalar_lea.hbm %s706_s30, 128  ;;  %s516_s12 = scalar_lea.hbm %s809_s2, 256 }
  0x12   : > { %p512_p11 = scmp.ne.s32.totalorder %s706_s30, %s511_s9  ;;  %p513_p12 = pneg %p710_p8 }
  0x13   : > { %p517_p1 = scmp.lt.s32.totalorder %s706_s30, %s809_s2  ;;  %p518_p2 = scmp.lt.s32.totalorder %s516_s12, %s511_s9 }
  0x14   : > { %p514_p13 = pnand %p513_p12, %p512_p11 }
  0x15   : > { %p519_p3 = por %p518_p2, %p517_p1 }
  0x16   : > { %p515_p0 = pneg %p514_p13 }
  0x18   : > { %p520_p4 = pnand %p519_p3, %p515_p0 }
  0x1a   : > { %523 = shalt.err (!%p520_p4)
}
  0x1b   : > { %s524_s15 = scalar_lea.vmem %s708_s6, 128  ;;  %s631_s21 = smov [#allocation3]  }
  0x1c   : > { %p525_p5 = scmp.ne.s32.totalorder %s708_s6, %s524_s15  ;;  %s529_s22 = sshll.u32 %s631_s21, 4  ;;  %s530_s22 = int_to_ptr.vmem [resolvable:$false] %s529_s22 }
  0x1d   : > { %s531_s25 = scalar_lea.vmem %s530_s22, 256  ;;  %p532_p13 = scmp.lt.s32.totalorder %s708_s6, %s530_s22 }
  0x1e   : > { %p527_p6 = pnand %p525_p5, %p513_p12  ;;  %p533_p9 = scmp.lt.s32.totalorder %s531_s25, %s524_s15 }
  0x20   : > { %p528_p11 = pneg %p527_p6  ;;  %p534_p10 = por %p533_p9, %p532_p13 }
  0x22   : > { %p535_p7 = pnand %p534_p10, %p528_p11 }
  0x24   : > { %538 = shalt.err (!%p535_p7)
}
  0x25   : > { %466 = dma.hbm_to_vmem [thread:$0]  (!%p710_p8), %s706_s30, 128, %s708_s6, %s155_s8  }
  0x26   : > { %p815_p0 = scmp.lt.s32.totalorder %s629_s18, 3  ;;  %p816_p1 = scmp.ge.s32.totalorder %s629_s18, 1 }
  0x28   : > { %p171_p12 = pnand %p816_p1, %p815_p0 }
  0x29   : > { %s176_s26 = sand.u32 (!%p171_p12), 1, %s621_s16   ;;  %p817_p9 = scmp.ne.s32.totalorder (!%p171_p12), %s813_s24, 0 }
  0x2a   : > { %174 = sbr.rel (%p171_p12) target bundleno = 714 (0x2ca), region = 32  ;;  %s443_s27 = sshll.u32 (!%p171_p12), %s176_s26, 3 }
  0x2b   : > { %s177_s28 = scalar_lea.sflag (!%p171_p12), [#allocation4], %s176_s26  ;;  %s180_s29 = scalar_lea.vmem (!%p171_p12), [#allocation3], %s443_s27 }
  0x2f   : > { %604 = dma.done.wait (%p817_p9), %s177_s28, 128  }
  0x30   : > { %606 = vsyncadd (%p817_p9), %s177_s28, 4294967168  ;;  %p444_p7 = scmp.ne.s32.totalorder %s680_s19, 0 }
  0x32   : > { %203 = sbr.rel (%p444_p7) target bundleno = 57 (0x39), region = 40 }
  0x37   : > { %vm204_vm0 = vcmask 64512   ;;  %v632_v0 = vmov 0.0  }
  0x38   : > { %205 = vst.msk [vmem:[#allocation2] sm:$0xff] %vm204_vm0, %v632_v0 }
  0x39 PF: > { %v207_v1 = vld [vmem:[%s808_s1] sm:$0xff]  ;;  %v633_v2 = vmov 0   ;;  %v215_v4 = vlaneseq  ;;  %v206_v6 = vld [vmem:[%s180_s29] sm:$0xff]  ;;  %vm279_vm1 = vcmask 7168   ;;  %vm281_vm2 = vcmask 15360   ;;  %p445_p8 = scmp.ne.s32.totalorder %s680_s19, 1 }
  0x3a   : > { %508 = vset.pattern.permute.xlu0 %v633_v2  ;;  %509 = vrcp.f32 %v207_v1  ;;  %vm283_vm3 = vcmask 23552   ;;  %vm285_vm4 = vcmask 31744   ;;  %vm287_vm5 = vcmask 39936  }
  0x3b   : > { %v748_v5 = vshrl.u32 %v215_v4, 7  ;;  %vm289_vm6 = vcmask 48128   ;;  %vm291_vm7 = vcmask 56320   ;;  %vm295_vm8 = vcmask 64512  }
  0x3d   : > { %v225_v7 = vsub.s32 1, %v748_v5  ;;  %v217_v8 = vsub.s32 0, %v748_v5  ;;  %v233_v9 = vsub.s32 2, %v748_v5  ;;  %v241_v15 = vsub.s32 3, %v748_v5 }
  0x3e   : > { %v249_v18 = vsub.s32 4, %v748_v5  ;;  %v257_v26 = vsub.s32 5, %v748_v5  ;;  %v265_v30 = vsub.s32 6, %v748_v5  ;;  %v273_v34 = vsub.s32 7, %v748_v5 }
  0x3f   : > { %v293_v53 = vld [vmem:[#allocation2] sm:$0xff] }
  0x47   : > { %v510_v3 = vpop.eup %509 }
  0x48   : > { %211 = vperm.xlu0 %508, %v510_v3  }
  0xc3   : > { %v212_v10 = vpop.permute.xlu0 %211 }
  0xc4   : > { %v214_v11 = vmul.f32 %v212_v10, %v206_v6 }
  0xc6   : > { %v226_v12 = vrot.slane %v214_v11, %v225_v7  ;;  %v218_v13 = vrot.slane %v214_v11, %v217_v8  ;;  %v234_v14 = vrot.slane %v214_v11, %v233_v9  ;;  %v242_v22 = vrot.slane %v214_v11, %v241_v15 }
  0xc7   : > { %v250_v25 = vrot.slane %v214_v11, %v249_v18  ;;  %v258_v29 = vrot.slane %v214_v11, %v257_v26  ;;  %v266_v33 = vrot.slane %v214_v11, %v265_v30  ;;  %v274_v37 = vrot.slane %v214_v11, %v273_v34 }
  0xc8   : > { %v227_v16 = vsub.f32 %v214_v11, %v226_v12  ;;  %v219_v17 = vsub.f32 %v214_v11, %v218_v13  ;;  %v235_v21 = vsub.f32 %v214_v11, %v234_v14  ;;  %v243_v24 = vsub.f32 %v214_v11, %v242_v22 }
  0xc9   : > { %v251_v28 = vsub.f32 %v214_v11, %v250_v25  ;;  %v259_v32 = vsub.f32 %v214_v11, %v258_v29  ;;  %v267_v36 = vsub.f32 %v214_v11, %v266_v33  ;;  %v275_v39 = vsub.f32 %v214_v11, %v274_v37 }
  0xca   : > { %v228_v19 = vand.u32 2147483647, %v227_v16  ;;  %v220_v20 = vand.u32 2147483647, %v219_v17  ;;  %v236_v23 = vand.u32 2147483647, %v235_v21 }
  0xcb   : > { %v244_v27 = vand.u32 2147483647, %v243_v24  ;;  %v252_v31 = vand.u32 2147483647, %v251_v28  ;;  %v260_v35 = vand.u32 2147483647, %v259_v32 }
  0xcc   : > { %229 = vmax.xlane.f32.xlu1 %v228_v19  ;;  %221 = vmax.xlane.f32.xlu0 %v220_v20  ;;  %v268_v38 = vand.u32 2147483647, %v267_v36  ;;  %v276_v40 = vand.u32 2147483647, %v275_v39 }
  0xd0   : > { %237 = vmax.xlane.f32.xlu1 %v236_v23 }
  0xd4   : > { %245 = vmax.xlane.f32.xlu1 %v244_v27 }
  0xd8   : > { %253 = vmax.xlane.f32.xlu1 %v252_v31 }
  0xdc   : > { %261 = vmax.xlane.f32.xlu1 %v260_v35 }
  0xe0   : > { %269 = vmax.xlane.f32.xlu1 %v268_v38 }
  0xe4   : > { %277 = vmax.xlane.f32.xlu1 %v276_v40 }
 0x155   : > { %v230_v41 = vpop.xlane.xlu1 %229  ;;  %v222_v45 = vpop.xlane.xlu0 %221 }
 0x156   : > { %v280_v47 = vsel %vm279_vm1, %v222_v45, %v230_v41 }
 0x159   : > { %v238_v42 = vpop.xlane.xlu1 %237 }
 0x15a   : > { %v282_v48 = vsel %vm281_vm2, %v280_v47, %v238_v42 }
 0x15d   : > { %v246_v43 = vpop.xlane.xlu1 %245 }
 0x15e   : > { %v284_v50 = vsel %vm283_vm3, %v282_v48, %v246_v43 }
 0x161   : > { %v254_v44 = vpop.xlane.xlu1 %253 }
 0x162   : > { %v286_v51 = vsel %vm285_vm4, %v284_v50, %v254_v44 }
 0x165   : > { %v262_v46 = vpop.xlane.xlu1 %261 }
 0x166   : > { %v288_v52 = vsel %vm287_vm5, %v286_v51, %v262_v46 }
 0x169   : > { %v270_v49 = vpop.xlane.xlu1 %269 }
 0x16a   : > { %v290_v54 = vsel %vm289_vm6, %v288_v52, %v270_v49 }
 0x16d   : > { %v278_v55 = vpop.xlane.xlu1 %277  ;;  %300 = sbr.rel (%p445_p8) target bundleno = 686 (0x2ae), region = 44 }
 0x16e   : > { %v292_v56 = vsel %vm291_vm7, %v290_v54, %v278_v55 }
 0x16f   : > { %v294_v57 = vmax.f32 %v293_v53, %v292_v56 }
 0x171   : > { %296 = vst.msk [vmem:[#allocation2] sm:$0xff] %vm295_vm8, %v294_v57 }
 0x172   : > { %v446_v58 = vld [vmem:[%s807_s0] ss:$0 sm:$0xff]  ;;  %v306_v59 = vand.u32 127, %v215_v4  ;;  %vm350_vm12 = vcmask 57344   ;;  %vm355_vm1 = vcmask 0  }
 0x174   : > { %vm307_vm9 = vcmp.eq.s32.totalorder %v748_v5, %v306_v59 }
 0x175   : > { %v312_v60 = vsel %vm307_vm9, %v446_v58, 0 }
 0x176   : > { %v313_v61 = vsel %vm295_vm8, %v312_v60, 0 }
 0x177   : > { %v315_v62 = vshrl.u32 %v313_v61, 16  ;;  %v314_v63 = vand.u32 65535, %v313_v61 }
 0x178   : > { %v301_v10 = vld [vmem:[#allocation2] sm:$0xff] }
 0x179   : > { %v317_v0 = vcvt.s32.f32 %v315_v62  ;;  %v316_v1 = vcvt.s32.f32 %v314_v63 }
 0x17b   : > { %320 = vadd.xlane.f32.xlu0 %v317_v0 }
 0x17f   : > { %318 = vadd.xlane.f32.xlu0 %v316_v1 }
 0x204   : > { %v321_v2 = vpop.xlane.xlu0 %320 }
 0x205   : > { %v323_v3 = vcvt.f32.s32 %v321_v2 }
 0x207   : > { %v324_v7 = vshll.u32 %v323_v3, 16 }
 0x208   : > { %v319_v6 = vpop.xlane.xlu0 %318 }
 0x209   : > { %v322_v8 = vcvt.f32.s32 %v319_v6 }
 0x20b   : > { %v325_v9 = vadd.s32 %v324_v7, %v322_v8 }
 0x20d   : > { %vm326_vm10 = vcmp.eq.s32.totalorder %v325_v9, %v446_v58 }
 0x20e   : > { %v327_v4 = vsel %vm326_vm10, inf, %v301_v10 }
 0x20f   : > { %v328_v11 = vsel %vm295_vm8, %v327_v4, inf }
 0x210   : > { %v329_v12 = vrot.slane %v328_v11, 4 }
 0x212   : > { %v330_v13 = vmin.f32 %v328_v11, %v329_v12 }
 0x214   : > { %v331_v14 = vrot.slane %v330_v13, 2 }
 0x216   : > { %v332_v15 = vmin.f32 %v330_v13, %v331_v14 }
 0x218   : > { %v333_v16 = vrot.slane %v332_v15, 1 }
 0x21a   : > { %v334_v17 = vmin.f32 %v332_v15, %v333_v16 }
 0x21c   : > { %v347_v18 = vand.u32 2147483647, %v334_v17  ;;  %vm335_vm11 = vcmp.eq.f32.partialorder %v327_v4, %v334_v17 }
 0x21d   : > { %v336_v19 = vsel %vm335_vm11, %v748_v5, 8 }
 0x21e   : > { %vm348_vm13 = vcmp.eq.f32.partialorder %v347_v18, inf  ;;  %v337_v20 = vsel %vm295_vm8, %v336_v19, 2147483647 }
 0x21f   : > { %v349_v21 = vsel %vm348_vm13, %v301_v10, %v334_v17  ;;  %v338_v22 = vrot.slane %v337_v20, 4 }
 0x220   : > { %v351_v23 = vsel %vm350_vm12, %v349_v21, 0.0 }
 0x221   : > { %352 = vadd.xlane.f32.xlu1 %v351_v23  ;;  %vm339_vm14 = vcmp.lt.s32.totalorder %v337_v20, %v338_v22 }
 0x222   : > { %v340_v24 = vsel %vm339_vm14, %v337_v20, %v338_v22 }
 0x223   : > { %v341_v25 = vrot.slane %v340_v24, 2 }
 0x225   : > { %vm342_vm15 = vcmp.lt.s32.totalorder %v340_v24, %v341_v25 }
 0x226   : > { %v343_v26 = vsel %vm342_vm15, %v340_v24, %v341_v25 }
 0x227   : > { %v344_v27 = vrot.slane %v343_v26, 1 }
 0x229   : > { %vm345_vm0 = vcmp.lt.s32.totalorder %v343_v26, %v344_v27 }
 0x22a   : > { %v346_v28 = vsel %vm345_vm0, %v343_v26, %v344_v27 }
 0x22b   : > { %357 = vst.msk [vmem:[#allocation7] sm:$0x1] %vm350_vm12, %v346_v28 }
 0x2aa   : > { %v353_v5 = vpop.xlane.xlu1 %352 }
 0x2ab   : > { %v354_v29 = vmul.f32 0.125, %v353_v5 }
 0x2ad   : > { %356 = vst.msk [vmem:[#allocation6] sm:$0x1] %vm355_vm1, %v354_v29 }
 0x2ae PF: > { %p468_p10 = scmp.eq.s32.totalorder %s680_s19, 1  ;;  %s634_s6 = smov [#allocation6]  }
 0x2af   : > { %s365_s7 = sshll.u32 %s634_s6, 4  ;;  %s635_s8 = smov [#allocation7]   ;;  %s366_s7 = int_to_ptr.vmem [resolvable:$true] %s365_s7 }
 0x2b0   : > { %s376_s9 = sshll.u32 %s635_s8, 4  ;;  %s539_s10 = scalar_lea.vmem %s366_s7, 16  ;;  %s377_s9 = int_to_ptr.vmem [resolvable:$true] %s376_s9 }
 0x2b1   : > { %p540_p2 = scmp.ne.s32.totalorder %s366_s7, %s539_s10  ;;  %s545_s11 = scalar_lea.vmem %s366_s7, 32 }
 0x2b2   : > { %p546_p5 = scmp.lt.s32.totalorder %s366_s7, %s366_s7  ;;  %p547_p6 = scmp.lt.s32.totalorder %s545_s11, %s539_s10 }
 0x2b3   : > { %p541_p3 = pnand %p540_p2, %p468_p10 }
 0x2b4   : > { %p548_p11 = por %p547_p6, %p546_p5 }
 0x2b5   : > { %p542_p4 = pneg %p541_p3 }
 0x2b7   : > { %p549_p13 = pnand %p548_p11, %p542_p4 }
 0x2b9   : > { %552 = shalt.err (!%p549_p13)
}
 0x2ba   : > { %456 = dma.vmem_to_hbm [thread:$0]  (%p468_p10), %s366_s7, 16, %s810_s3, [#allocation5]  }
 0x2bb   : > { %s563_s14 = scalar_lea.vmem %s377_s9, 16  ;;  %s569_s15 = scalar_lea.vmem %s377_s9, 32 }
 0x2bc   : > { %p564_p0 = scmp.ne.s32.totalorder %s377_s9, %s563_s14  ;;  %p570_p9 = scmp.lt.s32.totalorder %s377_s9, %s377_s9 }
 0x2bd   : > { %p571_p7 = scmp.lt.s32.totalorder %s569_s15, %s563_s14 }
 0x2be   : > { %p565_p1 = pnand %p564_p0, %p468_p10 }
 0x2bf   : > { %p572_p8 = por %p571_p7, %p570_p9 }
 0x2c0   : > { %p566_p12 = pneg %p565_p1 }
 0x2c2   : > { %p573_p2 = pnand %p572_p8, %p566_p12 }
 0x2c4   : > { %576 = shalt.err (!%p573_p2)
}
 0x2c5   : > { %458 = dma.vmem_to_hbm [thread:$0]  (%p468_p10), %s377_s9, 16, %s811_s4, [#allocation8]  }
 0x2c6   : > { %608 = dma.done.wait (%p468_p10), [#allocation5], 16  }
 0x2c7   : > { %610 = vsyncadd (%p468_p10), [#allocation5], 4294967280 }
 0x2c8   : > { %612 = dma.done.wait (%p468_p10), [#allocation8], 16  }
 0x2c9   : > { %614 = vsyncadd (%p468_p10), [#allocation8], 4294967280 }
 0x2ca PF: > { %p17_p3 = scmp.ge.s32.totalorder %s683_s20, 4   ;;  %s818_s15 = smov %s621_s16 }
 0x2cb   : > { %s819_s16 = smov %s625_s17  ;;  %s820_s17 = smov %s693_s23 }
 0x2cc   : > { %s821_s18 = smov %s683_s20  ;;  %19 = sbr.rel (!%p17_p3) target bundleno = 5 (0x5), region = 85 }
 0x2d1   :  { %393 = vsyncpa [#allocation4], 1 }
 0x2d2   :  { %395 = vsyncpa [#allocation4 + $0x1], 1 }
 0x2d3   :  { %396 = vsyncpa [#allocation5], 1 }
 0x2d4   :  { %398 = vsyncpa [#allocation5 + $0x1], 1 }
 0x2d5   :  { %399 = vsyncpa [#allocation8], 1 }

</bundles_post_ra>
